<compile_context>
chip_gen: v7x
topology: tpu7x:2x2x1
jax: 0.10.0
libtpu: 0.0.40
codegen_flags: <defaults>
</compile_context>

<pallas_src>
import functools

import jax
import jax.numpy as jnp
from jax import lax
from jax.experimental import pallas as pl
from jax.experimental.pallas import tpu as pltpu


_NEG_SENTINEL = float(-2.0 ** 32 + 1)    # Python float: inlined constant, not a captured array.


def _vmem_budget_and_limit():
    """(chooser budget, compiler limit) in bytes, keyed off the chip's VMEM capacity."""
    cap = None
    try:
        cap = pltpu.get_tpu_info().vmem_capacity_bytes
    except Exception:  # CPU / interpret mode / older runtimes
        cap = None
    if cap is not None and cap <= 64 * 1024 * 1024:       # v7x-class: 64 MiB per TC
        return 24 * 1024 * 1024, 40 * 1024 * 1024
    return 40 * 1024 * 1024, 48 * 1024 * 1024             # v5e / v6e: 128 MiB


def _sap_kernel(lens_ref, x_ref, *rest, num_heads, add_position):
    """One grid step: `block_b` full sequences, computed entirely in VMEM."""
    idx = 0
    pos_ref = None
    if add_position:
        pos_ref = rest[idx]; idx += 1
    w1_ref = rest[idx]; idx += 1
    w2_ref = rest[idx]; idx += 1
    wout_ref = None
    if num_heads > 1:
        wout_ref = rest[idx]; idx += 1
    out_ref = rest[idx]

    H = num_heads
    Bt, L, E = x_ref.shape

    # ---- prefix validity mask, lane-dense over L: (Bt, 1, L) bool.
    lens = lens_ref[...]                                           # (Bt, 1) int32
    pos_iota = lax.broadcasted_iota(jnp.int32, (Bt, 1, L), 2)
    valid = pos_iota < lens.reshape(Bt, 1, 1)                      # (Bt, 1, L)

    # ---- MLP input (x streamed bf16; padded rows are NOT zeroed — their
    #      scores are sentinel-masked below, so softmax/pooling are unchanged
    #      as long as padded x entries are finite).
    x = x_ref[...]                                                 # (Bt, L, E) bf16
    xp = x + pos_ref[...] if add_position else x                   # pos broadcasts over Bt

    # ---- attention scores: tanh(x @ W1) @ W2 on a (Bt*L, .) slab, f32 accumulation.
    x2d = xp.reshape(Bt * L, E)
    hidden = jnp.tanh(jnp.dot(x2d, w1_ref[...],
                              preferred_element_type=jnp.float32))  # (Bt*L, A) f32
    scores = jnp.dot(hidden.astype(jnp.bfloat16), w2_ref[...],
                     preferred_element_type=jnp.float32)            # (Bt*L, H) f32
    scores = jnp.transpose(scores.reshape(Bt, L, H), (0, 2, 1))     # (Bt, H, L) lane-dense

    # ---- masked softmax over the sequence (lane) axis, all f32 element-wise math.
    scores = jnp.where(valid, scores, _NEG_SENTINEL)                # (Bt, H, L)
    s_max = jnp.max(scores, axis=-1, keepdims=True)                 # (Bt, H, 1)
    p = jnp.exp(scores - s_max)                                     # exp(sentinel) == 0 exactly
    denom = jnp.sum(p, axis=-1, keepdims=True)
    att = p * pl.reciprocal(denom, approx=True)                     # (Bt, H, L) f32

    # ---- pooling: pooled[b,e,h] = sum_l x[b,l,e] * att[b,h,l]  (M=E fills the MXU).
    pooled = jnp.einsum('ble,bhl->beh', x, att.astype(jnp.bfloat16),
                        preferred_element_type=jnp.float32)         # (Bt, E, H) f32

    # ---- multi-head output projection as ONE matmul against e-major Wout [E*H, E].
    if H > 1:
        out = jnp.dot(pooled.reshape(Bt, E * H).astype(jnp.bfloat16),
                      wout_ref[...], preferred_element_type=jnp.float32)  # (Bt, E)
    else:
        out = pooled.reshape(Bt, E)
    out_ref[...] = out.astype(out_ref.dtype)


def _choose_block_b(B, L, E, A, H, add_position, budget_bytes):
    """Largest legal batch tile that fits the budget, preferring >= 4 grid steps."""
    def est(bb):
        x_blk = 2 * bb * L * E * 2                     # double-buffered bf16 input block
        lens_blk = 2 * bb * 4
        out_blk = 2 * bb * E * 4                       # double-buffered f32 output block
        consts = 2 * ((L * E * 2 if add_position else 0) + E * A * 2 + A * H * 2
                      + (H * E * E * 2 if H > 1 else 0))
        interm = bb * L * (4 * E + 6 * A + 12 * H) + bb * E * (6 * H + 8)
        return x_blk + lens_blk + out_blk + consts + interm

    # block_b must divide B and keep (block_b, .) blocks legal (multiple of 8 or full dim).
    # TODO(synk): batch sizes with no multiple-of-8 divisor fall back to block_b = B;
    # pad B on the host if that ever exceeds the VMEM limit.
    legal = [d for d in range(1, B + 1) if B % d == 0 and (d == B or d % 8 == 0)]
    pref = sorted((d for d in legal if B // d >= 4), reverse=True)   # >= 2x TensorCores
    rest = sorted((d for d in legal if B // d < 4), reverse=True)
    for d in pref + rest:
        if est(d) <= budget_bytes:
            return d
    return min(legal)


def self_attentive_pooling(x, mask, pos, w1, w2, wout=None, *, num_heads=1,
                           add_position=True, block_b=None):
    """x: [B, L, E] f32, mask: [B, L] bool (prefix/length mask). Returns [B, E] f32."""
    B, L, E = x.shape
    A = w1.shape[1]
    H = num_heads
    if H > 1:
        assert wout is not None and wout.shape == (H * E, E)

    # TODO(synk): the on-chip mask is rebuilt from per-sequence valid counts
    # (prefix/length masks, as produced by this module's typical callers);
    # arbitrary non-prefix masks would need the [B, L] mask passed through as
    # a lane-dense tensor instead of per-row lengths.
    lengths = jnp.sum(mask, axis=-1).astype(jnp.int32).reshape(B, 1)   # (B, 1) int32

    # Stream activations and weights as bf16 (one-time host casts); accumulate f32 in-kernel.
    xb = x.astype(jnp.bfloat16)
    posb = pos.astype(jnp.bfloat16) if add_position else None
    w1b = w1.astype(jnp.bfloat16)
    w2b = w2.astype(jnp.bfloat16)
    woutb = None
    if H > 1:
        # head-major [h*E+e, :] -> e-major [e*H+h, :] to match the (Bt, E, H) pooled layout.
        woutb = wout.reshape(H, E, E).transpose(1, 0, 2).reshape(E * H, E).astype(jnp.bfloat16)

    budget_bytes, limit_bytes = _vmem_budget_and_limit()
    if block_b is None:
        block_b = _choose_block_b(B, L, E, A, H, add_position, budget_bytes)
    grid = (B // block_b,)

    in_specs = [pl.BlockSpec((block_b, 1), lambda b: (b, 0)),              # lengths
                pl.BlockSpec((block_b, L, E), lambda b: (b, 0, 0))]        # x (bf16)
    inputs = [lengths, xb]
    if add_position:
        in_specs.append(pl.BlockSpec((1, L, E), lambda b: (0, 0, 0)))      # position enc (bf16)
        inputs.append(posb)
    in_specs.append(pl.BlockSpec((E, A), lambda b: (0, 0)))                # W1^T (bf16)
    inputs.append(w1b)
    in_specs.append(pl.BlockSpec((A, H), lambda b: (0, 0)))                # W2^T (bf16)
    inputs.append(w2b)
    if H > 1:
        in_specs.append(pl.BlockSpec((E * H, E), lambda b: (0, 0)))        # Wout e-major (bf16)
        inputs.append(woutb)

    flops = 2 * B * L * E * A + 2 * B * L * A * H + 2 * B * H * L * E
    if H > 1:
        flops += 2 * B * H * E * E
    bytes_accessed = (2 * (B * L * E + (L * E if add_position else 0)
                           + E * A + A * H + (H * E * E if H > 1 else 0))
                      + 4 * (B * E + B))

    kernel = functools.partial(_sap_kernel, num_heads=H, add_position=add_position)

    out = pl.pallas_call(
        kernel,
        out_shape=jax.ShapeDtypeStruct((B, E), jnp.float32),
        grid_spec=pltpu.PrefetchScalarGridSpec(
            num_scalar_prefetch=0,
            grid=grid,
            in_specs=in_specs,
            out_specs=pl.BlockSpec((block_b, E), lambda b: (b, 0)),
        ),
        compiler_params=pltpu.CompilerParams(
            dimension_semantics=("parallel",),          # batch elems independent (2 TCs on v7x)
            vmem_limit_bytes=limit_bytes),
        cost_estimate=pl.CostEstimate(
            flops=flops,
            transcendentals=B * L * A + B * H * L + B * H,
            bytes_accessed=bytes_accessed),
    )(*inputs)
    return out


def _reference(x, mask, pos, w1, w2, wout, *, num_heads, add_position=True):
    """Pure-JAX transcription of the PyTorch forward (for validation)."""
    fm = mask.astype(jnp.float32)[..., None]
    xm = x * fm
    xa = xm + pos if add_position else xm
    hidden = jnp.tanh(xa @ w1)
    att = hidden @ w2                                       # [B, L, H]
    att = jnp.swapaxes(att, 1, 2)                           # [B, H, L]
    amask = jnp.repeat(mask[:, None, :], num_heads, axis=1)
    att = jnp.where(amask, att, jnp.float32(-2.0 ** 32 + 1))
    att = jax.nn.softmax(att, axis=-1)
    pooled = jnp.einsum('bhl,ble->bhe', att, xm)
    flat = pooled.reshape(pooled.shape[0], -1)
    if num_heads > 1:
        flat = flat @ wout
    return flat


if __name__ == "__main__":
    B, L, E, A, H = 2, 8, 32, 32, 2

    key = jax.random.PRNGKey(0)
    kx, kp, k1, k2, ko = jax.random.split(key, 5)

    x = jax.random.normal(kx, (B, L, E), jnp.float32)
    lengths = jnp.array([8, 5], jnp.int32)
    mask = jnp.arange(L)[None, :] < lengths[:, None]              # [B, L] bool (prefix mask)

    # Deterministic synthetic parameters (module __init__ shapes).
    pos = jax.random.normal(kp, (1, L, E), jnp.float32)           # position_encoding
    w1 = jax.random.normal(k1, (E, A), jnp.float32) * 0.1         # Linear(E->A).weight.T
    w2 = jax.random.normal(k2, (A, H), jnp.float32) * 0.1         # Linear(A->H).weight.T
    wout = jax.random.normal(ko, (H * E, E), jnp.float32) * 0.1   # Linear(H*E->E).weight.T

    out = self_attentive_pooling(x, mask, pos, w1, w2, wout,
                                 num_heads=H, add_position=True)
    out = jax.block_until_ready(out)

    ref = _reference(x, mask, pos, w1, w2, wout, num_heads=H, add_position=True)
    assert out.shape == (B, E)
    # bf16 streamed operands with f32 accumulation + approx reciprocal: relaxed tolerance.
    assert jnp.allclose(out, ref, atol=3e-2, rtol=3e-2), (
        f"max abs err {jnp.max(jnp.abs(out - ref))}")

    print("KERNEL_OK")
</pallas_src>

<mosaic_0001>
module attributes {stable_mosaic.version = 11 : i64} {
  func.func @_sap_kernel(%arg0: i32, %arg1: memref<2x1xi32, #tpu.memory_space<vmem>>, %arg2: memref<2x8x32xbf16, #tpu.memory_space<vmem>>, %arg3: memref<1x8x32xbf16, #tpu.memory_space<vmem>>, %arg4: memref<32x32xbf16, #tpu.memory_space<vmem>>, %arg5: memref<32x2xbf16, #tpu.memory_space<vmem>>, %arg6: memref<64x32xbf16, #tpu.memory_space<vmem>>, %arg7: memref<2x32xf32, #tpu.memory_space<vmem>>) attributes {dimension_semantics = [#tpu.dimension_semantics<parallel>], iteration_bounds = array<i64: 1>, scalar_prefetch = 0 : i64, scratch_operands = 0 : i64, tpu.core_type = #tpu.core_type<tc>, window_params = [{transform_indices = @transform_0, window_bounds = array<i64: 2, 1>}, {transform_indices = @transform_1, window_bounds = array<i64: 2, 8, 32>}, {pipeline_mode = #tpu.pipeline_mode<synchronous>, transform_indices = @transform_2, window_bounds = array<i64: 1, 8, 32>}, {pipeline_mode = #tpu.pipeline_mode<synchronous>, transform_indices = @transform_3, window_bounds = array<i64: 32, 32>}, {pipeline_mode = #tpu.pipeline_mode<synchronous>, transform_indices = @transform_4, window_bounds = array<i64: 32, 2>}, {pipeline_mode = #tpu.pipeline_mode<synchronous>, transform_indices = @transform_5, window_bounds = array<i64: 64, 32>}, {transform_indices = @transform_6, window_bounds = array<i64: 2, 32>}]} {
    %c0 = arith.constant 0 : index
    %c0_0 = arith.constant 0 : index
    %0 = vector.load %arg1[%c0, %c0_0] : memref<2x1xi32, #tpu.memory_space<vmem>>, vector<2x1xi32>
    %1 = tpu.iota {dimensions = array<i32: 2>} : vector<2x1x8xi32>
    %2 = vector.shape_cast %0 : vector<2x1xi32> to vector<2x1x1xi32>
    %3 = vector.broadcast %2 : vector<2x1x1xi32> to vector<2x1x8xi32>
    %4 = arith.cmpi slt, %1, %3 : vector<2x1x8xi32>
    %c0_1 = arith.constant 0 : index
    %c0_2 = arith.constant 0 : index
    %c0_3 = arith.constant 0 : index
    %5 = vector.load %arg2[%c0_1, %c0_2, %c0_3] : memref<2x8x32xbf16, #tpu.memory_space<vmem>>, vector<2x8x32xbf16>
    %c0_4 = arith.constant 0 : index
    %c0_5 = arith.constant 0 : index
    %c0_6 = arith.constant 0 : index
    %6 = vector.load %arg3[%c0_4, %c0_5, %c0_6] : memref<1x8x32xbf16, #tpu.memory_space<vmem>>, vector<1x8x32xbf16>
    %7 = vector.broadcast %6 : vector<1x8x32xbf16> to vector<2x8x32xbf16>
    %8 = arith.addf %5, %7 : vector<2x8x32xbf16>
    %9 = vector.shape_cast %8 : vector<2x8x32xbf16> to vector<16x32xbf16>
    %c0_7 = arith.constant 0 : index
    %c0_8 = arith.constant 0 : index
    %10 = vector.load %arg4[%c0_7, %c0_8] : memref<32x32xbf16, #tpu.memory_space<vmem>>, vector<32x32xbf16>
    %cst = arith.constant dense<0.000000e+00> : vector<16x32xf32>
    %11 = tpu.matmul %9, %10, %cst {dimension_numbers = #tpu.dot_dimension_numbers<[1], [0], [0], [1], [0, 0, 1, 1], [], []>} : vector<16x32xbf16>, vector<32x32xbf16>, vector<16x32xf32> -> vector<16x32xf32>
    %12 = math.tanh %11 : vector<16x32xf32>
    %13 = arith.truncf %12 : vector<16x32xf32> to vector<16x32xbf16>
    %c0_9 = arith.constant 0 : index
    %c0_10 = arith.constant 0 : index
    %14 = vector.load %arg5[%c0_9, %c0_10] : memref<32x2xbf16, #tpu.memory_space<vmem>>, vector<32x2xbf16>
    %cst_11 = arith.constant dense<0.000000e+00> : vector<16x2xf32>
    %15 = tpu.matmul %13, %14, %cst_11 {dimension_numbers = #tpu.dot_dimension_numbers<[1], [0], [0], [1], [0, 0, 1, 1], [], []>} : vector<16x32xbf16>, vector<32x2xbf16>, vector<16x2xf32> -> vector<16x2xf32>
    %16 = vector.shape_cast %15 : vector<16x2xf32> to vector<2x8x2xf32>
    %17 = tpu.transpose %16, [0, 2, 1] : vector<2x8x2xf32> -> vector<2x2x8xf32>
    %cst_12 = arith.constant -4.2949673E+9 : f32
    %18 = vector.shape_cast %4 : vector<2x1x8xi1> to vector<2x1x8xi1>
    %19 = vector.broadcast %18 : vector<2x1x8xi1> to vector<2x2x8xi1>
    %20 = vector.broadcast %cst_12 : f32 to vector<2x2x8xf32>
    %21 = arith.select %19, %17, %20 : vector<2x2x8xi1>, vector<2x2x8xf32>
    %cst_13 = arith.constant dense<0xFF800000> : vector<2x2xf32>
    %22 = vector.multi_reduction <maximumf>, %21, %cst_13 [2] : vector<2x2x8xf32> to vector<2x2xf32>
    %23 = vector.shape_cast %22 : vector<2x2xf32> to vector<2x2x1xf32>
    %24 = vector.broadcast %23 : vector<2x2x1xf32> to vector<2x2x8xf32>
    %25 = arith.subf %21, %24 : vector<2x2x8xf32>
    %26 = math.exp %25 : vector<2x2x8xf32>
    %cst_14 = arith.constant dense<0.000000e+00> : vector<2x2xf32>
    %27 = vector.multi_reduction <add>, %26, %cst_14 [2] : vector<2x2x8xf32> to vector<2x2xf32>
    %28 = vector.shape_cast %27 : vector<2x2xf32> to vector<2x2x1xf32>
    %29 = tpu.reciprocal %28 {approx = true} : vector<2x2x1xf32> -> vector<2x2x1xf32>
    %30 = vector.broadcast %29 : vector<2x2x1xf32> to vector<2x2x8xf32>
    %31 = arith.mulf %26, %30 : vector<2x2x8xf32>
    %32 = arith.truncf %31 : vector<2x2x8xf32> to vector<2x2x8xbf16>
    "tpu.trace_start"() <{level = 10 : i32, message = "ble,bhl->beh"}> : () -> ()
    %cst_15 = arith.constant dense<0.000000e+00> : vector<2x32x2xf32>
    %33 = tpu.matmul %5, %32, %cst_15 {dimension_numbers = #tpu.dot_dimension_numbers<[1], [2], [2], [1], [0, 0, 0, 2, 1, 1], [0], [0]>} : vector<2x8x32xbf16>, vector<2x2x8xbf16>, vector<2x32x2xf32> -> vector<2x32x2xf32>
    "tpu.trace_stop"() : () -> ()
    %34 = vector.shape_cast %33 : vector<2x32x2xf32> to vector<2x64xf32>
    %35 = arith.truncf %34 : vector<2x64xf32> to vector<2x64xbf16>
    %c0_16 = arith.constant 0 : index
    %c0_17 = arith.constant 0 : index
    %36 = vector.load %arg6[%c0_16, %c0_17] : memref<64x32xbf16, #tpu.memory_space<vmem>>, vector<64x32xbf16>
    %cst_18 = arith.constant dense<0.000000e+00> : vector<2x32xf32>
    %37 = tpu.matmul %35, %36, %cst_18 {dimension_numbers = #tpu.dot_dimension_numbers<[1], [0], [0], [1], [0, 0, 1, 1], [], []>} : vector<2x64xbf16>, vector<64x32xbf16>, vector<2x32xf32> -> vector<2x32xf32>
    %c0_19 = arith.constant 0 : index
    %c0_20 = arith.constant 0 : index
    %38 = vector.load %arg7[%c0_19, %c0_20] : memref<2x32xf32, #tpu.memory_space<vmem>>, vector<2x32xf32>
    tpu.vector_store %arg7[%c0_19, %c0_20], %37 {strides = array<i32>} : memref<2x32xf32, #tpu.memory_space<vmem>>, vector<2x32xf32>,
    return
  }
  func.func @transform_0(%arg0: i32) -> (i32, i32) {
    %c0_i32 = arith.constant 0 : i32
    %c0_i32_0 = arith.constant 0 : i32
    return %arg0, %c0_i32 : i32, i32
  }
  func.func @transform_1(%arg0: i32) -> (i32, i32, i32) {
    %c0_i32 = arith.constant 0 : i32
    %c0_i32_0 = arith.constant 0 : i32
    %c0_i32_1 = arith.constant 0 : i32
    return %arg0, %c0_i32, %c0_i32_0 : i32, i32, i32
  }
  func.func @transform_2(%arg0: i32) -> (i32, i32, i32) {
    %c0_i32 = arith.constant 0 : i32
    %c0_i32_0 = arith.constant 0 : i32
    %c0_i32_1 = arith.constant 0 : i32
    %c0_i32_2 = arith.constant 0 : i32
    return %c0_i32, %c0_i32_0, %c0_i32_1 : i32, i32, i32
  }
  func.func @transform_3(%arg0: i32) -> (i32, i32) {
    %c0_i32 = arith.constant 0 : i32
    %c0_i32_0 = arith.constant 0 : i32
    %c0_i32_1 = arith.constant 0 : i32
    return %c0_i32, %c0_i32_0 : i32, i32
  }
  func.func @transform_4(%arg0: i32) -> (i32, i32) {
    %c0_i32 = arith.constant 0 : i32
    %c0_i32_0 = arith.constant 0 : i32
    %c0_i32_1 = arith.constant 0 : i32
    return %c0_i32, %c0_i32_0 : i32, i32
  }
  func.func @transform_5(%arg0: i32) -> (i32, i32) {
    %c0_i32 = arith.constant 0 : i32
    %c0_i32_0 = arith.constant 0 : i32
    %c0_i32_1 = arith.constant 0 : i32
    return %c0_i32, %c0_i32_0 : i32, i32
  }
  func.func @transform_6(%arg0: i32) -> (i32, i32) {
    %c0_i32 = arith.constant 0 : i32
    %c0_i32_0 = arith.constant 0 : i32
    return %arg0, %c0_i32 : i32, i32
  }
}

</mosaic_0001>

<bundles_post_ra>
// kernel: tpu_custom_call.1
= control target key start
LH: loop header
LB: loop body
LE: loop exit
PB: predicated region body
PF: predicated region fallthrough
CT: control target
= control target key end

     0   :  { %v1144_v1 = vmov 0.0   ;;  %vm1145_vm0 = vmmov 0   ;;  %vm92_vm1 = vcmask 261120   ;;  %s1405_s0 = inlined_call_operand.vmem [shape: s32[2,1], index: 0, kind: input, shape index: {}]   ;;  %s1406_s1 = inlined_call_operand.vmem [shape: bf16[2,8,32], index: 1, kind: input, shape index: {}]   ;;  %s1407_s2 = inlined_call_operand.vmem [shape: bf16[1,8,32], index: 2, kind: input, shape index: {}]   ;;  %s1408_s3 = inlined_call_operand.vmem [shape: bf16[32,32], index: 3, kind: input, shape index: {}]   ;;  %s1409_s4 = inlined_call_operand.vmem [shape: bf16[32,2], index: 4, kind: input, shape index: {}]   ;;  %s1410_s5 = inlined_call_operand.vmem [shape: bf16[64,32], index: 5, kind: input, shape index: {}]   ;;  %s1411_s6 = inlined_call_operand.hbm [shape: f32[2,32], index: 6, kind: output, shape index: {}]  }
   0x1   :  { %v1100_v0 = vld [vmem:[%s1408_s3] sm:$0xff]   ;;  %1019 = vmatprep.subr.bf16.mxu1 %v1144_v1  ;;  %v1101_v2 = vld [vmem:[%s1408_s3 + $0x8] sm:$0xff]   ;;  %1023 = vmatprep.mubr.msk.bf16.mxu1 %vm1145_vm0, %v1144_v1 }
   0x2   :  { %1020 = vmatpush3.bf16.msra.mxu1 %v1100_v0  ;;  %v1229_v3 = vld [vmem:[%s1406_s1] sm:$0xf]  ;;  %v1234_v4 = vld [vmem:[%s1406_s1 + $0x4] sm:$0xf] }
   0x3   :  { %v68_v5 = vld [vmem:[%s1407_s2] sm:$0xf]  ;;  %1021 = vmatprep.subr.bf16.mxu1 %v1144_v1 }
   0x4   :  { %v69_v6 = vadd.bf16 %v68_v5, %v1229_v3  ;;  %v70_v7 = vadd.bf16 %v68_v5, %v1234_v4 }
   0x6   :  { %v986_v8 = vcombine.low %v69_v6, %v70_v7  ;;  %1022 = vmatpush3.bf16.msra.mxu1 %v1101_v2 }
   0x7   :  { %1027 = vmatprep.subr.bf16.mxu1 %v1144_v1 }
   0x8   :  { %11 = vsyncpa [#allocation3], 0  ;;  %v1102_v9 = vld [vmem:[%s1409_s4] sm:$0xff]   ;;  %v1103_v10 = vld [vmem:[%s1409_s4 + $0x8] sm:$0xff]   ;;  %v26_v11 = vlaneseq  ;;  %v1146_v12 = vmov 0   ;;  %vm270_vm3 = vcmask 58368  }
   0x9   :  { %1024 = vmatmul.mubr.msk.bf16.vlgmr.msra.gmra.mrb[0].mxu1 %vm92_vm1, %v986_v8  ;;  %1099 = vset.pattern.permute.xlu0 %v1146_v12  ;;  %v1147_v13 = vmov 1966171168   ;;  %v985_v17 = vld.sshfl [vmem:[%s1405_s0] sm:$0x11 pattern:$0x75316420] }
   0xa   :  { %1031 = vmatprep.mubr.msk.bf16.mxu1 %vm1145_vm0, %v1144_v1  ;;  %1028 = vmatpush3.bf16.msra.mxu1 %v1102_v9  ;;  %v37_v14 = vunpack.c.l.s4 %v1147_v13  ;;  %v1253_v15 = vshrl.u32 %v26_v11, 7  ;;  %v35_v19 = vcombine.high %v985_v17, %v985_v17  ;;  %v27_v36 = vand.u32 127, %v26_v11  ;;  %s1150_s0 = smov 32   ;;  %s1151_s4 = smov 34  }
   0xb   :  { %1029 = vmatprep.subr.bf16.mxu1 %v1144_v1  ;;  %vm311_vm5 = vcmask 64512   ;;  %v1148_v6 = vmov 1983009808   ;;  %v1149_v9 = vmov 1934713408   ;;  %s1152_s10 = smov 36  }
   0xc   :  { %v38_v16 = vunpack.c.0.s8 %v37_v14  ;;  %v55_v33 = vsub.s32 0, %v1253_v15  ;;  %v446_v7 = vunpack.c.l.s4 %v1148_v6  ;;  %s1153_s11 = smov 38   ;;  %s1154_s12 = smov 4   ;;  %vm832_vm6 = vcmask 15360  }
   0xd   :  { %s1155_s13 = smov 2   ;;  %s1156_s14 = smov 40   ;;  %vm834_vm7 = vcmask 31744   ;;  %vm836_vm8 = vcmask 48128   ;;  %vm839_vm9 = vcmask 80896   ;;  %vm841_vm10 = vcmask 97280  }
   0xe   :  { %1030 = vmatpush3.bf16.msra.mxu1 %v1103_v10  ;;  %v41_v18 = vsub.s32 %v38_v16, %v1253_v15  ;;  %v447_v8 = vunpack.c.0.s8 %v446_v7  ;;  %v477_v10 = vunpack.c.l.s4 %v1149_v9  ;;  %s1157_s15 = smov 42   ;;  %s1158_s16 = smov 44   ;;  %vm843_vm11 = vcmask 113664  }
   0xf   :  { %s1159_s17 = smov 46   ;;  %s1160_s18 = smov 6   ;;  %vm845_vm12 = vcmask 130048   ;;  %vm847_vm13 = vcmask 146432   ;;  %vm849_vm14 = vcmask 162816   ;;  %vm851_vm15 = vcmask 179200  }
  0x10   :  { %v42_v20 = vrot.slane %v985_v17, %v41_v18  ;;  %v49_v21 = vrot.slane %v35_v19, %v41_v18  ;;  %v450_v11 = vsub.s32 %v447_v8, %v1253_v15  ;;  %v478_v12 = vunpack.c.0.s8 %v477_v10  ;;  %s1161_s19 = smov 10   ;;  %s1162_s20 = smov 8  }
  0x11   :  { %s1163_s21 = smov 14   ;;  %s1164_s22 = smov 12  }
  0x12   :  { %51 = vperm.xlu0 %1099, %v42_v20   ;;  %s1165_s23 = smov 18   ;;  %s1166_s24 = smov 16  }
  0x13   :  { %s1167_s25 = smov 22   ;;  %s1168_s26 = smov 20  }
  0x14   :  { %s1169_s27 = smov 26   ;;  %s1170_s30 = smov 24  }
  0x15   :  { %s1171_s1 = smov 30   ;;  %s1172_s7 = smov 28  }
  0x16   :  { %58 = vperm.xlu0 %1099, %v49_v21  }
  0x91   :  { %v52_v34 = vpop.permute.xlu0 %51 }
  0x92   :  { %v56_v35 = vrot.slane %v52_v34, %v55_v33 }
  0x94   :  { %vm64_vm2 = vcmp.lt.s32.totalorder %v27_v36, %v56_v35 }
  0x95   :  { %v59_v37 = vpop.permute.xlu0 %58 }
  0x96   :  { %v63_v38 = vrot.slane %v59_v37, %v55_v33 }
  0x98   :  { %vm65_vm4 = vcmp.lt.s32.totalorder %v27_v36, %v63_v38 }
  0xdc   :  { %v130_v22 = vpop.f32.mrb[0].mxu1 }
  0xdd   :  { %v1025_v23 = vpop.f32.mrb[1].mxu1  ;;  %1108 = vtanh.f32 %v130_v22  ;;  %v1283_v22 = vsub.s32 %v478_v12, %v1253_v15 }
  0xde   :  { %v133_v24 = vpop.f32.mrb[2].mxu1 }
  0xdf   :  { %1110 = vtanh.f32 %v133_v24  ;;  %v1026_v25 = vpop.f32.mrb[3].mxu1 }
  0xe7   :  { %v1109_v26 = vpop.eup %1108 }
  0xe9   :  { %v1111_v27 = vpop.eup %1110 }
  0xea   :  { %v139_v28 = vpack.c.bf16 %v1111_v27, %v1109_v26 }
  0xec   :  { %1032 = vmatmul.mubr.msk.bf16.vlgmr.msra.gmra.mrb[4].mxu1 %vm92_vm1, %v139_v28 }
 0x1bf   :  { %v193_v29 = vpop.f32.mrb[4].mxu1 }
 0x1c0   :  { %200 = vxpose.xlu1.b32.start.end [1/1] (short) (narrow) %v193_v29, 8  ;;  %v1033_v30 = vpop.f32.mrb[5].mxu1 }
 0x1c1   :  { %v196_v31 = vpop.f32.mrb[6].mxu1 }
 0x1c2   :  { %v1034_v32 = vpop.f32.mrb[7].mxu1 }
 0x1c4   :  { %232 = vxpose.xlu1.b32.start.end [1/1] (short) (narrow) %v196_v31, 8 }
 0x240   :  { %v216_v39 = vpop.trf.xlu1 }
 0x241   :  { %v268_v40 = vsel %vm64_vm2, %v216_v39, -4.2949673e+09  ;;  %vm855_vm2 = vcmask 211968  }
 0x242   :  { %v271_v41 = vsel %vm270_vm3, %v268_v40, -inf }
 0x243   :  { %272 = vmax.xlane.f32.xlu0 %v271_v41 }
 0x244   :  { %v248_v42 = vpop.trf.xlu1 }
 0x245   :  { %v269_v43 = vsel %vm65_vm4, %v248_v42, -4.2949673e+09  ;;  %vm859_vm4 = vcmask 244736  }
 0x246   :  { %v274_v44 = vsel %vm270_vm3, %v269_v43, -inf }
 0x247   :  { %275 = vmax.xlane.f32.xlu1 %v274_v44 }
 0x274   :  { %370 = vxpose.xlu1.c.b16.start.end [1/1] (short) (narrow) %v1234_v4, 32 }
 0x2d0   :  { %v273_v45 = vpop.xlane.xlu0 %272 }
 0x2d1   :  { %v277_v46 = vsub.f32 %v268_v40, %v273_v45 }
 0x2d3   :  { %v279_v47 = vmul.f32 1.442695, %v277_v46 }
 0x2d4   :  { %v276_v48 = vpop.xlane.xlu1 %275 }
 0x2d5   :  { %1112 = vpow2.f32 %v279_v47  ;;  %v278_v49 = vsub.f32 %v269_v43, %v276_v48 }
 0x2d7   :  { %v281_v50 = vmul.f32 1.442695, %v278_v49 }
 0x2d9   :  { %1114 = vpow2.f32 %v281_v50 }
 0x2da   :  { %v378_v55 = vpop.trf.xlu1 }
 0x2db   :  { %1043 = vmatprep.mubr.msk.bf16.mxu1 %vm311_vm5, %v378_v55 }
 0x2de   :  { %v379_v5 = vpop.trf.xlu1 }
 0x2df   :  { %v1113_v51 = vpop.eup %1112 }
 0x2e0   :  { %v283_v52 = vsel %vm270_vm3, %v1113_v51, 0.0 }
 0x2e1   :  { %284 = vadd.xlane.f32.xlu0 %v283_v52 }
 0x2e3   :  { %v1115_v53 = vpop.eup %1114 }
 0x2e4   :  { %v286_v54 = vsel %vm270_vm3, %v1115_v53, 0.0  ;;  %vm857_vm3 = vcmask 228352  }
 0x2e5   :  { %287 = vadd.xlane.f32.xlu0 %v286_v54 }
 0x312   :  { %295 = vxpose.xlu0.c.b16.start.end [1/1] (short) (narrow) %v1229_v3, 32 }
 0x36e   :  { %v285_v56 = vpop.xlane.xlu0 %284 }
 0x36f   :  { %1116 = vrcp.f32 %v285_v56 }
 0x372   :  { %v288_v57 = vpop.xlane.xlu0 %287 }
 0x373   :  { %1118 = vrcp.f32 %v288_v57 }
 0x378   :  { %v303_v58 = vpop.trf.xlu0 }
 0x379   :  { %v1117_v59 = vpop.eup %1116  ;;  %1037 = vmatprep.mubr.msk.bf16.mxu0 %vm311_vm5, %v303_v58 }
 0x37a   :  { %v291_v60 = vmul.f32 %v1117_v59, %v1113_v51 }
 0x37c   :  { %v293_v61 = vpack.c.bf16 %v291_v60, %v291_v60  ;;  %v304_v4 = vpop.trf.xlu0 }
 0x37d   :  { %v1119_v62 = vpop.eup %1118 }
 0x37e   :  { %1059 = vmatprep.subr.msk.bf16.mxu0 %vm311_vm5, %v293_v61  ;;  %v319_v63 = vsel %vm311_vm5, %v293_v61, 0  ;;  %v292_v0 = vmul.f32 %v1119_v62, %v1115_v53 }
 0x37f   :  { %1036 = vmatpush3.bf16.xpose.msra.mxu0 %v319_v63 }
 0x380   :  { %v294_v2 = vpack.c.bf16 %v292_v0, %v292_v0  ;;  %1047 = vmatprep.subr.bf16.mxu0 %v1144_v1 }
 0x382   :  { %1060 = vmatprep.subr.msk.bf16.mxu1 %vm311_vm5, %v294_v2  ;;  %v393_v3 = vsel %vm311_vm5, %v294_v2, 0 }
 0x383   :  { %1042 = vmatpush3.bf16.xpose.msra.mxu1 %v393_v3 }
 0x386   :  { %1038 = vmatmul.mubr.msk.bf16.vlgmr.msra.gmra.mrb[0].mxu0 %vm311_vm5, %v304_v4 }
 0x387   :  { %1055 = vmatprep.mubr.msk.bf16.mxu0 %vm1145_vm0, %v1144_v1  ;;  %vm853_vm0 = vcmask 195584  }
 0x38a   :  { %1044 = vmatmul.mubr.msk.bf16.vlgmr.msra.gmra.mrb[8].mxu1 %vm311_vm5, %v379_v5 }
 0x459   :  { %v1039_v13 = vpop.f32.mrb[0].mxu0 }
 0x45a   :  { %v576_v14 = vcombine.high %v1039_v13, %v1144_v1  ;;  %v355_v16 = vpop.f32.mrb[1].mxu0  ;;  %v583_v19 = vrot.slane %v1039_v13, %v450_v11 }
 0x45b   :  { %v444_v17 = vcombine.high %v355_v16, %v1144_v1  ;;  %v1040_v18 = vpop.f32.mrb[2].mxu0  ;;  %v451_v24 = vrot.slane %v355_v16, %v450_v11 }
 0x45c   :  { %v642_v20 = vcombine.high %v1040_v18, %v1144_v1  ;;  %v358_v21 = vpop.f32.mrb[3].mxu0  ;;  %v1285_v23 = vrot.slane %v576_v14, %v450_v11  ;;  %v1289_v27 = vrot.slane %v1040_v18, %v450_v11 }
 0x45d   :  { %v1045_v25 = vpop.f32.mrb[8].mxu1  ;;  %v1287_v26 = vrot.slane %v444_v17, %v450_v11  ;;  %v510_v32 = vcombine.high %v358_v21, %v1144_v1  ;;  %v517_v48 = vrot.slane %v358_v21, %v450_v11 }
 0x45e   :  { %v591_v28 = vcombine.high %v1045_v25, %v1144_v1  ;;  %v598_v29 = vrot.slane %v1045_v25, %v450_v11  ;;  %v429_v30 = vpop.f32.mrb[9].mxu1  ;;  %v1292_v31 = vrot.slane %v642_v20, %v450_v11 }
 0x45f   :  { %v459_v33 = vcombine.high %v429_v30, %v1144_v1  ;;  %v466_v15 = vrot.slane %v429_v30, %v450_v11  ;;  %v1046_v34 = vpop.f32.mrb[10].mxu1  ;;  %v1314_v56 = vrot.slane %v510_v32, %v450_v11  ;;  %v1106_v32 = vld [vmem:[%s1410_s5 + $0x10] sm:$0xff]  }
 0x460   :  { %v605_v35 = vrot.slane %v591_v28, %v450_v11  ;;  %v606_v36 = vcombine.low %v583_v19, %v598_v29  ;;  %v607_v37 = vcombine.high %v583_v19, %v598_v29  ;;  %v657_v38 = vcombine.high %v1046_v34, %v1144_v1  ;;  %v432_v39 = vpop.f32.mrb[11].mxu1  ;;  %v1105_v28 = vld [vmem:[%s1410_s5 + $0x8] sm:$0xff]  }
 0x461   :  { %v473_v40 = vrot.slane %v459_v33, %v450_v11  ;;  %v474_v41 = vcombine.low %v451_v24, %v466_v15  ;;  %v475_v42 = vcombine.high %v451_v24, %v466_v15  ;;  %v1297_v43 = vrot.slane %v1046_v34, %v450_v11  ;;  %v1104_v24 = vld [vmem:[%s1410_s5] sm:$0xff]   ;;  %v1107_v15 = vld [vmem:[%s1410_s5 + $0x18] sm:$0xff]   ;;  %s1180_s5 = smov 60  }
 0x462   :  { %v622_v44 = vcombine.low %v1285_v23, %v605_v35  ;;  %v623_v45 = vcombine.high %v1285_v23, %v605_v35  ;;  %v1301_v46 = vrot.slane %v657_v38, %v450_v11  ;;  %v525_v47 = vcombine.high %v432_v39, %v1144_v1  ;;  %1048 = vmatpush3.bf16.msra.mxu0 %v1104_v24 }
 0x463   :  { %v490_v49 = vcombine.low %v1287_v26, %v473_v40  ;;  %v491_v50 = vcombine.high %v1287_v26, %v473_v40  ;;  %v672_v51 = vcombine.low %v1289_v27, %v1297_v43  ;;  %v673_v52 = vcombine.high %v1289_v27, %v1297_v43  ;;  %1049 = vmatprep.subr.bf16.mxu0 %v1144_v1 }
 0x464   :  { %v688_v53 = vcombine.low %v1292_v31, %v1301_v46  ;;  %v689_v54 = vcombine.high %v1292_v31, %v1301_v46  ;;  %v532_v55 = vrot.slane %v432_v39, %v450_v11  ;;  %v1316_v57 = vrot.slane %v525_v47, %v450_v11 }
 0x465   :  { %v614_v58 = vrot.slane %v606_v36, %v1283_v22  ;;  %v621_v0 = vrot.slane %v607_v37, %v1283_v22  ;;  %v1326_v2 = vrot.slane %v474_v41, %v1283_v22  ;;  %v489_v4 = vrot.slane %v475_v42, %v1283_v22 }
 0x466   :  { %v540_v59 = vcombine.low %v517_v48, %v532_v55  ;;  %v541_v60 = vcombine.high %v517_v48, %v532_v55  ;;  %v556_v61 = vcombine.low %v1314_v56, %v1316_v57  ;;  %v557_v62 = vcombine.high %v1314_v56, %v1316_v57  ;;  %1050 = vmatpush3.bf16.msra.mxu0 %v1105_v28 }
 0x467   :  { %769 = vrot.lane.b32.xlu1 %v614_v58, %s1150_s0  ;;  %v638_v63 = vcombine.high %v614_v58, %v1144_v1  ;;  %v639_v3 = vcombine.high %v621_v0, %v1144_v1  ;;  %v506_v5 = vcombine.high %v1326_v2, %v1144_v1  ;;  %v630_v6 = vrot.slane %v622_v44, %v1283_v22  ;;  %s1173_s0 = smov 50  }
 0x468   :  { %v637_v8 = vrot.slane %v623_v45, %v1283_v22  ;;  %v498_v10 = vrot.slane %v490_v49, %v1283_v22  ;;  %v507_v11 = vcombine.high %v489_v4, %v1144_v1  ;;  %v505_v13 = vrot.slane %v491_v50, %v1283_v22  ;;  %1051 = vmatprep.subr.bf16.mxu0 %v1144_v1 }
 0x469   :  { %773 = vrot.lane.b32.xlu0 %v638_v63, %s1151_s4  ;;  %v640_v7 = vcombine.high %v630_v6, %v1144_v1  ;;  %v548_v14 = vrot.slane %v540_v59, %v1283_v22  ;;  %v555_v17 = vrot.slane %v541_v60, %v1283_v22  ;;  %v564_v20 = vrot.slane %v556_v61, %v1283_v22  ;;  %s1174_s4 = smov 48  }
 0x46a   :  { %v641_v9 = vcombine.high %v637_v8, %v1144_v1  ;;  %v508_v12 = vcombine.high %v498_v10, %v1144_v1  ;;  %v509_v16 = vcombine.high %v505_v13, %v1144_v1  ;;  %v571_v23 = vrot.slane %v557_v62, %v1283_v22  ;;  %1052 = vmatpush3.bf16.msra.mxu0 %v1106_v32 }
 0x46b   :  { %777 = vrot.lane.b32.xlu1 %v621_v0, %s1152_s10  ;;  %v572_v18 = vcombine.high %v548_v14, %v1144_v1  ;;  %v573_v19 = vcombine.high %v555_v17, %v1144_v1  ;;  %v574_v21 = vcombine.high %v564_v20, %v1144_v1  ;;  %v680_v25 = vrot.slane %v672_v51, %v1283_v22 }
 0x46c   :  { %v575_v26 = vcombine.high %v571_v23, %v1144_v1  ;;  %v687_v29 = vrot.slane %v673_v52, %v1283_v22  ;;  %v696_v27 = vrot.slane %v688_v53, %v1283_v22  ;;  %1053 = vmatprep.subr.bf16.mxu0 %v1144_v1  ;;  %v703_v35 = vrot.slane %v689_v54, %v1283_v22 }
 0x46d   :  { %781 = vrot.lane.b32.xlu0 %v639_v3, %s1153_s11  ;;  %v704_v30 = vcombine.high %v680_v25, %v1144_v1 }
 0x46e   :  { %v705_v33 = vcombine.high %v687_v29, %v1144_v1  ;;  %v706_v34 = vcombine.high %v696_v27, %v1144_v1  ;;  %1054 = vmatpush3.bf16.msra.mxu0 %v1107_v15  ;;  %v707_v36 = vcombine.high %v703_v35, %v1144_v1 }
 0x46f   :  { %713 = vrot.lane.b32.xlu1 %v489_v4, %s1154_s12  ;;  %s1175_s12 = smov 54  }
 0x471   :  { %709 = vrot.lane.b32.xlu0 %v506_v5, %s1155_s13  ;;  %s1176_s13 = smov 52  }
 0x473   :  { %785 = vrot.lane.b32.xlu1 %v630_v6, %s1156_s14  ;;  %s1177_s14 = smov 58  }
 0x475   :  { %789 = vrot.lane.b32.xlu0 %v640_v7, %s1157_s15  ;;  %s1178_s15 = smov 56  }
 0x477   :  { %793 = vrot.lane.b32.xlu1 %v637_v8, %s1158_s16  ;;  %s1179_s16 = smov 62  }
 0x479   :  { %797 = vrot.lane.b32.xlu0 %v641_v9, %s1159_s17  ;;  %s1181_s17 = smov [#allocation2]  }
 0x47b   :  { %717 = vrot.lane.b32.xlu1 %v507_v11, %s1160_s18  ;;  %s977_s18 = sshll.u32 %s1181_s17, 4  ;;  %s978_s18 = int_to_ptr.vmem [resolvable:$true] %s977_s18 }
 0x47c   :  { %p1125_p1 = scmp.lt.s32.totalorder %s978_s18, %s978_s18 }
 0x47d   :  { %725 = vrot.lane.b32.xlu0 %v508_v12, %s1161_s19  ;;  %s1120_s19 = scalar_lea.vmem %s978_s18, 32 }
 0x47e   :  { %p1121_p0 = scmp.ne.s32.totalorder %s978_s18, %s1120_s19  ;;  %p1126_p2 = scmp.lt.s32.totalorder %s1120_s19, %s1120_s19 }
 0x47f   :  { %721 = vrot.lane.b32.xlu1 %v498_v10, %s1162_s20 }
 0x480   :  { %p1127_p3 = por %p1126_p2, %p1125_p1 }
 0x481   :  { %733 = vrot.lane.b32.xlu0 %v509_v16, %s1163_s21 }
 0x482   :  { %p1128_p4 = pnand %p1127_p3, %p1121_p0 }
 0x483   :  { %729 = vrot.lane.b32.xlu1 %v505_v13, %s1164_s22 }
 0x485   :  { %741 = vrot.lane.b32.xlu0 %v572_v18, %s1165_s23 }
 0x487   :  { %737 = vrot.lane.b32.xlu1 %v548_v14, %s1166_s24 }
 0x489   :  { %749 = vrot.lane.b32.xlu0 %v573_v19, %s1167_s25 }
 0x48b   :  { %745 = vrot.lane.b32.xlu1 %v555_v17, %s1168_s26 }
 0x48d   :  { %757 = vrot.lane.b32.xlu0 %v574_v21, %s1169_s27 }
 0x48f   :  { %753 = vrot.lane.b32.xlu1 %v564_v20, %s1170_s30 }
 0x491   :  { %765 = vrot.lane.b32.xlu0 %v575_v26, %s1171_s1 }
 0x493   :  { %761 = vrot.lane.b32.xlu1 %v571_v23, %s1172_s7 }
 0x495   :  { %805 = vrot.lane.b32.xlu0 %v704_v30, %s1173_s0 }
 0x497   :  { %801 = vrot.lane.b32.xlu1 %v680_v25, %s1174_s4 }
 0x499   :  { %813 = vrot.lane.b32.xlu0 %v705_v33, %s1175_s12 }
 0x49b   :  { %809 = vrot.lane.b32.xlu1 %v687_v29, %s1176_s13 }
 0x49d   :  { %821 = vrot.lane.b32.xlu0 %v706_v34, %s1177_s14 }
 0x49f   :  { %817 = vrot.lane.b32.xlu1 %v696_v27, %s1178_s15 }
 0x4a1   :  { %829 = vrot.lane.b32.xlu0 %v707_v36, %s1179_s16 }
 0x4a3   :  { %825 = vrot.lane.b32.xlu1 %v703_v35, %s1180_s5 }
 0x4d9   :  { %v770_v37 = vpop.permute.xlu1 %769 }
 0x4db   :  { %v774_v38 = vpop.permute.xlu0 %773 }
 0x4dd   :  { %v778_v39 = vpop.permute.xlu1 %777 }
 0x4df   :  { %v782_v40 = vpop.permute.xlu0 %781 }
 0x4e1   :  { %v714_v41 = vpop.permute.xlu1 %713 }
 0x4e3   :  { %v710_v42 = vpop.permute.xlu0 %709 }
 0x4e4   :  { %v833_v45 = vsel %vm832_vm6, %v1326_v2, %v710_v42  ;;  %vm864_vm6 = vcmask 293888  }
 0x4e5   :  { %v786_v43 = vpop.permute.xlu1 %785  ;;  %v835_v47 = vsel %vm834_vm7, %v833_v45, %v714_v41  ;;  %vm866_vm7 = vcmask 310272  }
 0x4e7   :  { %v790_v31 = vpop.permute.xlu0 %789 }
 0x4e9   :  { %v1384_v22 = vpop.permute.xlu1 %793 }
 0x4eb   :  { %v1386_v44 = vpop.permute.xlu0 %797 }
 0x4ed   :  { %v718_v1 = vpop.permute.xlu1 %717 }
 0x4ee   :  { %v837_v48 = vsel %vm836_vm8, %v835_v47, %v718_v1  ;;  %vm868_vm8 = vcmask 326656  }
 0x4ef   :  { %v726_v46 = vpop.permute.xlu0 %725 }
 0x4f1   :  { %v722_v49 = vpop.permute.xlu1 %721 }
 0x4f2   :  { %v838_v50 = vsel %vm311_vm5, %v837_v48, %v722_v49  ;;  %vm862_vm5 = vcmask 277504  }
 0x4f3   :  { %v734_v51 = vpop.permute.xlu0 %733  ;;  %v840_v53 = vsel %vm839_vm9, %v838_v50, %v726_v46  ;;  %vm870_vm9 = vcmask 343040  }
 0x4f5   :  { %v730_v52 = vpop.permute.xlu1 %729 }
 0x4f6   :  { %v842_v54 = vsel %vm841_vm10, %v840_v53, %v730_v52  ;;  %vm872_vm10 = vcmask 359424  }
 0x4f7   :  { %v742_v55 = vpop.permute.xlu0 %741  ;;  %v844_v56 = vsel %vm843_vm11, %v842_v54, %v734_v51  ;;  %vm874_vm11 = vcmask 375808  }
 0x4f9   :  { %v738_v57 = vpop.permute.xlu1 %737 }
 0x4fa   :  { %v846_v58 = vsel %vm845_vm12, %v844_v56, %v738_v57  ;;  %vm876_vm12 = vcmask 392192  }
 0x4fb   :  { %v750_v59 = vpop.permute.xlu0 %749  ;;  %v848_v61 = vsel %vm847_vm13, %v846_v58, %v742_v55  ;;  %vm878_vm13 = vcmask 408576  }
 0x4fd   :  { %v746_v60 = vpop.permute.xlu1 %745 }
 0x4fe   :  { %v850_v62 = vsel %vm849_vm14, %v848_v61, %v746_v60  ;;  %vm882_vm14 = vcmask 441344  }
 0x4ff   :  { %v758_v63 = vpop.permute.xlu0 %757  ;;  %v852_v0 = vsel %vm851_vm15, %v850_v62, %v750_v59  ;;  %vm884_vm15 = vcmask 457728  }
 0x501   :  { %v754_v2 = vpop.permute.xlu1 %753 }
 0x502   :  { %v854_v3 = vsel %vm853_vm0, %v852_v0, %v754_v2  ;;  %vm886_vm0 = vcmask 474112  }
 0x503   :  { %v766_v4 = vpop.permute.xlu0 %765  ;;  %v856_v6 = vsel %vm855_vm2, %v854_v3, %v758_v63  ;;  %vm888_vm2 = vcmask 490496  }
 0x505   :  { %v762_v5 = vpop.permute.xlu1 %761 }
 0x506   :  { %v858_v7 = vsel %vm857_vm3, %v856_v6, %v762_v5  ;;  %vm890_vm3 = vcmask 506880  }
 0x507   :  { %v860_v8 = vsel %vm859_vm4, %v858_v7, %v766_v4  ;;  %v806_v9 = vpop.permute.xlu0 %805  ;;  %vm925_vm4 = vcmask 523264  }
 0x508   :  { %v861_v10 = vsel %vm92_vm1, %v860_v8, %v770_v37  ;;  %vm880_vm1 = vcmask 424960  }
 0x509   :  { %v863_v11 = vsel %vm862_vm5, %v861_v10, %v774_v38  ;;  %v802_v12 = vpop.permute.xlu1 %801  ;;  %vm969_vm5 = vcmask 254976  }
 0x50a   :  { %v865_v13 = vsel %vm864_vm6, %v863_v11, %v778_v39 }
 0x50b   :  { %v867_v14 = vsel %vm866_vm7, %v865_v13, %v782_v40  ;;  %v814_v16 = vpop.permute.xlu0 %813 }
 0x50c   :  { %v869_v17 = vsel %vm868_vm8, %v867_v14, %v786_v43 }
 0x50d   :  { %v871_v18 = vsel %vm870_vm9, %v869_v17, %v790_v31  ;;  %v810_v19 = vpop.permute.xlu1 %809 }
 0x50e   :  { %v873_v20 = vsel %vm872_vm10, %v871_v18, %v1384_v22 }
 0x50f   :  { %v875_v21 = vsel %vm874_vm11, %v873_v20, %v1386_v44  ;;  %v822_v24 = vpop.permute.xlu0 %821 }
 0x510   :  { %v877_v23 = vsel %vm876_vm12, %v875_v21, %v802_v12 }
 0x511   :  { %v879_v25 = vsel %vm878_vm13, %v877_v23, %v806_v9  ;;  %v818_v26 = vpop.permute.xlu1 %817 }
 0x512   :  { %v881_v28 = vsel %vm880_vm1, %v879_v25, %v810_v19 }
 0x513   :  { %v883_v29 = vsel %vm882_vm14, %v881_v28, %v814_v16  ;;  %v830_v27 = vpop.permute.xlu0 %829 }
 0x514   :  { %v885_v30 = vsel %vm884_vm15, %v883_v29, %v818_v26 }
 0x515   :  { %v826_v32 = vpop.permute.xlu1 %825  ;;  %v887_v33 = vsel %vm886_vm0, %v885_v30, %v822_v24 }
 0x516   :  { %v889_v15 = vsel %vm888_vm2, %v887_v33, %v826_v32 }
 0x517   :  { %v891_v34 = vsel %vm890_vm3, %v889_v15, %v830_v27 }
 0x518   :  { %v892_v35 = vpack.c.bf16 %v891_v34, %v891_v34 }
 0x51a   :  { %1056 = vmatmul.mubr.msk.bf16.vlgmr.msra.gmra.mrb[4].mxu0 %vm925_vm4, %v892_v35 }
 0x5ed   :  { %v963_v36 = vpop.f32.mrb[4].mxu0 }
 0x5ee   :  { %970 = vst.msk [vmem:[#allocation2] sm:$0x3] %vm969_vm5, %v963_v36  ;;  %v1057_v37 = vpop.f32.mrb[5].mxu0 }
 0x5ef   :  { %v966_v38 = vpop.f32.mrb[6].mxu0 }
 0x5f0   :  { %1131 = shalt.err (!%p1128_p4)
}
 0x5f1   :  { %s1132_s22 = scalar_lea.hbm %s1411_s6, 32 }
 0x5f2   :  { %p1133_p5 = scmp.ne.s32.totalorder %s1411_s6, %s1132_s22  ;;  %p1136_p6 = scmp.lt.u32.totalorder %s1132_s22, %s1411_s6 }
 0x5f4   :  { %p1138_p7 = pnand %p1136_p6, %p1133_p5 }
 0x5f6   :  { %1141 = shalt.err (!%p1138_p7)
}
 0x5f7   :  { %980 = dma.vmem_to_hbm [thread:$0]  %s978_s18, 32, %s1411_s6, [#allocation3]   ;;  %v1058_v39 = vpop.f32.mrb[7].mxu0 }
 0x5f8   :  { %1142 = dma.done.wait [#allocation3], 32  }
 0x5f9   :  { %1143 = vsyncadd [#allocation3], 4294967264 }
 0x5fa   :  { %984 = vsyncpa [#allocation3], 1 }

</bundles_post_ra>
